<compile_context>
chip_gen: v7x
topology: tpu7x:2x2x1
jax: 0.10.0
libtpu: 0.0.40
codegen_flags: <defaults>
</compile_context>

<pallas_src>
import functools

import jax
import jax.numpy as jnp
from jax.experimental import pallas as pl
from jax.experimental.pallas import tpu as pltpu

_LANE = 128      # last-dim (lane) granularity
_SUBLANE = 8     # second-to-last-dim (sublane) granularity
_SUPPORTED_ACTS = (None, "tanh", "relu")


def _round_up(n: int, m: int) -> int:
    return ((n + m - 1) // m) * m


def _mlp_fused_kernel(x_ref, w_ref, b_ref, o_ref, *, activations):
    """Fused forward for the whole MLP in one (grid-less) kernel invocation.

    x_ref : (B_pad, F_pad)      f32  zero-padded input
    w_ref : (L, F_pad, F_pad)   f32  packed per-layer weights (padded = 0)
    b_ref : (L, 1, F_pad)       f32  packed per-layer biases  (padded = 0)
    o_ref : (B_pad, F_pad)      f32
    All trailing dims are multiples of (8, 128) -> lane-dense, unmasked stores.
    """
    h = x_ref[...]
    for i, act in enumerate(activations):
        w = w_ref[i]          # static index -> free view into the VMEM slab
        b = b_ref[i]
        h = jnp.dot(h, w, preferred_element_type=jnp.float32) + b
        if act == "tanh":
            h = jnp.tanh(h)          # EUP; tanh(0)=0 keeps padded lanes zero
        elif act == "relu":
            h = jnp.maximum(h, 0.0)  # VPU; relu(0)=0 keeps padded lanes zero
        elif act is not None:
            raise ValueError(f"unsupported activation: {act}")
    o_ref[...] = h.astype(o_ref.dtype)


def _mlp_forward(x, w_slab, b_slab, *, activations, layer_dims, out_size,
                 f_pad):
    """Pad -> fused Pallas kernel -> slice.  Designed to run under jax.jit."""
    B, in_size = x.shape
    B_pad = _round_up(B, _SUBLANE)
    x_pad = jnp.pad(x.astype(jnp.float32),
                    ((0, B_pad - B), (0, f_pad - in_size)))

    # Advisory cost estimate for XLA's scheduler: UNPADDED work.
    flops = 0
    transcendentals = 0
    for (fan_in, fan_out), act in zip(layer_dims, activations):
        flops += 2 * B * fan_in * fan_out
        if act == "tanh":
            transcendentals += B * fan_out
    param_elems = sum(fi * fo + fo for fi, fo in layer_dims)
    bytes_accessed = 4 * (B * in_size + param_elems + B * out_size)

    kernel = functools.partial(_mlp_fused_kernel, activations=activations)
    out_pad = pl.pallas_call(
        kernel,
        out_shape=jax.ShapeDtypeStruct((B_pad, f_pad), jnp.float32),
        in_specs=[pl.BlockSpec(memory_space=pltpu.MemorySpace.VMEM)] * 3,
        out_specs=pl.BlockSpec(memory_space=pltpu.MemorySpace.VMEM),
        cost_estimate=pl.CostEstimate(
            flops=int(flops),
            transcendentals=int(transcendentals),
            bytes_accessed=int(bytes_accessed)),
    )(x_pad, w_slab, b_slab)

    # Slice away the zero padding (rows = batch pad, cols = lane pad).
    return out_pad[:B, :out_size]


class MLP:
    """JAX/Pallas port of the PyTorch MLP.

    layers_data: list of (size, activation) where activation is None, "tanh"
    or "relu" (mirrors passing nn.Tanh()/nn.ReLU() in PyTorch).
    """

    def __init__(self, input_size, layers_data, key):
        self.input_size = int(input_size)
        self.layers_data = [(int(s), a) for s, a in layers_data]
        self.activations = tuple(a for _, a in self.layers_data)
        for act in self.activations:
            if act not in _SUPPORTED_ACTS:
                raise ValueError(
                    f"activation {act!r} not supported; padded-lane invariant "
                    f"requires elementwise f with f(0)=0: {_SUPPORTED_ACTS}")
        self.out_size = self.layers_data[-1][0]

        # Common padded feature width so every layer's weight has the same
        # (F_pad, F_pad) shape and packs into ONE contiguous VMEM slab.
        feat_dims = [self.input_size] + [s for s, _ in self.layers_data]
        self.f_pad = _round_up(max(feat_dims), _LANE)

        self.params = []        # unpadded (W (in,out), b (out,)) — reference
        w_layers, b_layers, layer_dims = [], [], []
        in_size = self.input_size
        for size, _ in self.layers_data:
            key, kw, kb = jax.random.split(key, 3)
            # Deterministic init matching PyTorch nn.Linear default:
            # U(-1/sqrt(fan_in), 1/sqrt(fan_in)) for both weight and bias.
            bound = 1.0 / float(in_size) ** 0.5
            w = jax.random.uniform(kw, (in_size, size), jnp.float32,
                                   minval=-bound, maxval=bound)
            b = jax.random.uniform(kb, (size,), jnp.float32,
                                   minval=-bound, maxval=bound)
            self.params.append((w, b))
            layer_dims.append((in_size, size))

            w_layers.append(jnp.pad(w, ((0, self.f_pad - in_size),
                                        (0, self.f_pad - size))))
            b_layers.append(jnp.pad(b[None, :], ((0, 0),
                                                 (0, self.f_pad - size))))
            in_size = size

        # TODO(synk): store these as bf16 (keeping preferred_element_type=f32)
        # when the large-shape tiled path lands; at these shapes f32 keeps
        # exact parity with the reference.
        self.w_slab = jnp.stack(w_layers)          # (L, F_pad, F_pad) f32
        self.b_slab = jnp.stack(b_layers)          # (L, 1, F_pad)     f32
        self.layer_dims = tuple(layer_dims)

        # One jitted executable for the whole forward (pad + kernel + slice).
        self._forward = jax.jit(functools.partial(
            _mlp_forward,
            activations=self.activations,
            layer_dims=self.layer_dims,
            out_size=self.out_size,
            f_pad=self.f_pad))

    def __call__(self, x):
        assert x.ndim == 2 and x.shape[-1] == self.input_size
        return self._forward(x, self.w_slab, self.b_slab)


if __name__ == "__main__":
    key = jax.random.PRNGKey(0)
    key, kx, kp = jax.random.split(key, 3)

    batch = 8
    input_size = 16
    # (size, activation) pairs — tanh hidden layers, linear output head.
    layers_data = [(32, "tanh"), (32, "tanh"), (4, None)]

    model = MLP(input_size, layers_data, kp)
    x = jax.random.normal(kx, (batch, input_size), jnp.float32)

    out = model(x)
    out = jax.block_until_ready(out)

    # Pure-JAX reference check of the fused kernel (unpadded params).
    ref = x
    for (w, b), act in zip(model.params, model.activations):
        ref = ref @ w + b
        if act == "tanh":
            ref = jnp.tanh(ref)
        elif act == "relu":
            ref = jnp.maximum(ref, 0.0)

    assert out.shape == (batch, layers_data[-1][0])
    assert jnp.allclose(out, ref, atol=1e-5, rtol=1e-5), (
        f"max abs err {jnp.max(jnp.abs(out - ref))}")

    print("KERNEL_OK")
</pallas_src>

<mosaic_0001>
module attributes {stable_mosaic.version = 11 : i64} {
  func.func @_mlp_fused_kernel(%arg0: memref<8x128xf32, #tpu.memory_space<vmem>>, %arg1: memref<3x128x128xf32, #tpu.memory_space<vmem>>, %arg2: memref<3x1x128xf32, #tpu.memory_space<vmem>>, %arg3: memref<8x128xf32, #tpu.memory_space<vmem>>) attributes {dimension_semantics = [], scalar_prefetch = 0 : i64, scratch_operands = 0 : i64, tpu.core_type = #tpu.core_type<tc>} {
    %c0 = arith.constant 0 : index
    %c0_0 = arith.constant 0 : index
    %0 = vector.load %arg0[%c0, %c0_0] : memref<8x128xf32, #tpu.memory_space<vmem>>, vector<8x128xf32>
    %c0_1 = arith.constant 0 : index
    %c0_2 = arith.constant 0 : index
    %c0_3 = arith.constant 0 : index
    %1 = vector.load %arg1[%c0_1, %c0_2, %c0_3] : memref<3x128x128xf32, #tpu.memory_space<vmem>>, vector<1x128x128xf32>
    %2 = vector.shape_cast %1 : vector<1x128x128xf32> to vector<128x128xf32>
    %c0_4 = arith.constant 0 : index
    %c0_5 = arith.constant 0 : index
    %c0_6 = arith.constant 0 : index
    %3 = vector.load %arg2[%c0_4, %c0_5, %c0_6] : memref<3x1x128xf32, #tpu.memory_space<vmem>>, vector<1x1x128xf32>
    %4 = vector.shape_cast %3 : vector<1x1x128xf32> to vector<1x128xf32>
    %cst = arith.constant dense<0.000000e+00> : vector<8x128xf32>
    %5 = tpu.matmul %0, %2, %cst {dimension_numbers = #tpu.dot_dimension_numbers<[1], [0], [0], [1], [0, 0, 1, 1], [], []>} : vector<8x128xf32>, vector<128x128xf32>, vector<8x128xf32> -> vector<8x128xf32>
    %6 = vector.broadcast %4 : vector<1x128xf32> to vector<8x128xf32>
    %7 = arith.addf %5, %6 : vector<8x128xf32>
    %8 = math.tanh %7 : vector<8x128xf32>
    %c1 = arith.constant 1 : index
    %c0_7 = arith.constant 0 : index
    %c0_8 = arith.constant 0 : index
    %9 = vector.load %arg1[%c1, %c0_7, %c0_8] : memref<3x128x128xf32, #tpu.memory_space<vmem>>, vector<1x128x128xf32>
    %10 = vector.shape_cast %9 : vector<1x128x128xf32> to vector<128x128xf32>
    %c1_9 = arith.constant 1 : index
    %c0_10 = arith.constant 0 : index
    %c0_11 = arith.constant 0 : index
    %11 = vector.load %arg2[%c1_9, %c0_10, %c0_11] : memref<3x1x128xf32, #tpu.memory_space<vmem>>, vector<1x1x128xf32>
    %12 = vector.shape_cast %11 : vector<1x1x128xf32> to vector<1x128xf32>
    %cst_12 = arith.constant dense<0.000000e+00> : vector<8x128xf32>
    %13 = tpu.matmul %8, %10, %cst_12 {dimension_numbers = #tpu.dot_dimension_numbers<[1], [0], [0], [1], [0, 0, 1, 1], [], []>} : vector<8x128xf32>, vector<128x128xf32>, vector<8x128xf32> -> vector<8x128xf32>
    %14 = vector.broadcast %12 : vector<1x128xf32> to vector<8x128xf32>
    %15 = arith.addf %13, %14 : vector<8x128xf32>
    %16 = math.tanh %15 : vector<8x128xf32>
    %c2 = arith.constant 2 : index
    %c0_13 = arith.constant 0 : index
    %c0_14 = arith.constant 0 : index
    %17 = vector.load %arg1[%c2, %c0_13, %c0_14] : memref<3x128x128xf32, #tpu.memory_space<vmem>>, vector<1x128x128xf32>
    %18 = vector.shape_cast %17 : vector<1x128x128xf32> to vector<128x128xf32>
    %c2_15 = arith.constant 2 : index
    %c0_16 = arith.constant 0 : index
    %c0_17 = arith.constant 0 : index
    %19 = vector.load %arg2[%c2_15, %c0_16, %c0_17] : memref<3x1x128xf32, #tpu.memory_space<vmem>>, vector<1x1x128xf32>
    %20 = vector.shape_cast %19 : vector<1x1x128xf32> to vector<1x128xf32>
    %cst_18 = arith.constant dense<0.000000e+00> : vector<8x128xf32>
    %21 = tpu.matmul %16, %18, %cst_18 {dimension_numbers = #tpu.dot_dimension_numbers<[1], [0], [0], [1], [0, 0, 1, 1], [], []>} : vector<8x128xf32>, vector<128x128xf32>, vector<8x128xf32> -> vector<8x128xf32>
    %22 = vector.broadcast %20 : vector<1x128xf32> to vector<8x128xf32>
    %23 = arith.addf %21, %22 : vector<8x128xf32>
    %c0_19 = arith.constant 0 : index
    %c0_20 = arith.constant 0 : index
    %24 = vector.load %arg3[%c0_19, %c0_20] : memref<8x128xf32, #tpu.memory_space<vmem>>, vector<8x128xf32>
    tpu.vector_store %arg3[%c0_19, %c0_20], %23 {strides = array<i32>} : memref<8x128xf32, #tpu.memory_space<vmem>>, vector<8x128xf32>,
    return
  }
}

</mosaic_0001>

<bundles_post_ra>
// kernel: _mlp_forward.1
= control target key start
LH: loop header
LB: loop body
LE: loop exit
PB: predicated region body
PF: predicated region fallthrough
CT: control target
= control target key end

     0   :  { %8 = vsyncpa [#allocation3], 0  ;;  %s587_s12 = smov [#allocation2]   ;;  %s670_s0 = inlined_call_operand.vmem [shape: f32[8,128], index: 0, kind: input, shape index: {}]   ;;  %s671_s1 = inlined_call_operand.hbm [shape: f32[3,128,128], index: 1, kind: input, shape index: {}]   ;;  %s672_s2 = inlined_call_operand.vmem [shape: f32[3,1,128], index: 2, kind: input, shape index: {}]   ;;  %s673_s3 = inlined_call_operand.vmem [shape: f32[8,128], index: 3, kind: output, shape index: {}]  }
   0x1   :  { %s16_s13 = sshll.u32 %s587_s12, 4  ;;  %s563_s16 = scalar_lea.hbm %s671_s1, 6144  ;;  %s17_s13 = int_to_ptr.vmem [resolvable:$true] %s16_s13 }
   0x2   :  { %p564_p0 = scmp.ne.s32.totalorder %s671_s1, %s563_s16  ;;  %p567_p1 = scmp.lt.u32.totalorder %s563_s16, %s671_s1 }
   0x4   :  { %p569_p2 = pnand %p567_p1, %p564_p0 }
   0x6   :  { %572 = shalt.err (!%p569_p2)
}
   0x7   :  { %s573_s21 = scalar_lea.vmem %s17_s13, 6144  ;;  %p578_p4 = scmp.lt.s32.totalorder %s17_s13, %s17_s13 }
   0x8   :  { %p574_p3 = scmp.ne.s32.totalorder %s17_s13, %s573_s21  ;;  %p579_p5 = scmp.lt.s32.totalorder %s573_s21, %s573_s21 }
   0xa   :  { %p580_p6 = por %p579_p5, %p578_p4 }
   0xc   :  { %p581_p7 = pnand %p580_p6, %p574_p3 }
   0xe   :  { %584 = shalt.err (!%p581_p7)
}
   0xf   :  { %s588_s22 = smov 128   ;;  %s589_s23 = smov 8  }
  0x10   :  { %22 = dma.hbm_to_vmem [thread:$0]  %s671_s1, 6144, %s17_s13, [#allocation3], %s588_s22, %s588_s22, %s589_s23  }
  0x11   :  { %585 = dma.done.wait [#allocation3], 6144  }
  0x12   :  { %586 = vsyncadd [#allocation3], 4294961152  ;;  %v590_v0 = vmov 0.0|0.0   ;;  %vm591_vm0 = vmmov 0   ;;  %v592_v1 = vmov 0.0   ;;  %v29_v2 = vld [vmem:[#allocation2] sm:$0xff] }
  0x13   :  { %481 = vmatprep.subr.bf16.mxu0 %v590_v0  ;;  %408 = vmatprep.mubr.msk.f32.mxu0 %vm591_vm0, %v592_v1  ;;  %v30_v3 = vld [vmem:[#allocation2 + $0x8] sm:$0xff]  ;;  %v31_v4 = vld [vmem:[#allocation2 + $0x10] sm:$0xff]  ;;  %v32_v6 = vld [vmem:[#allocation2 + $0x18] sm:$0xff] }
  0x14   :  { %505 = vmatprep.subr.bf16.mxu1 %v590_v0  ;;  %443 = vmatprep.mubr.msk.f32.mxu1 %vm591_vm0, %v592_v1  ;;  %v482_v5 = vpack.c.bf16 %v30_v3, %v29_v2  ;;  %v485_v7 = vpack.c.bf16 %v32_v6, %v31_v4  ;;  %v33_v8 = vld [vmem:[#allocation2 + $0x20] sm:$0xff]  ;;  %v34_v9 = vld [vmem:[#allocation2 + $0x28] sm:$0xff]  ;;  %v126_v12 = vld [vmem:[#allocation2 + $0x90] sm:$0xff] }
  0x15   :  { %v124_v10 = vld [vmem:[#allocation2 + $0x80] sm:$0xff]  ;;  %v125_v11 = vld [vmem:[#allocation2 + $0x88] sm:$0xff]  ;;  %v127_v13 = vld [vmem:[#allocation2 + $0x98] sm:$0xff]  ;;  %v488_v14 = vpack.c.bf16 %v34_v9, %v33_v8 }
  0x16   :  { %483 = vmatpush3.bf16.msra.mxu0 %v482_v5  ;;  %v506_v15 = vpack.c.bf16 %v125_v11, %v124_v10  ;;  %v35_v16 = vld [vmem:[#allocation2 + $0x30] sm:$0xff]  ;;  %v36_v17 = vld [vmem:[#allocation2 + $0x38] sm:$0xff]  ;;  %v509_v18 = vpack.c.bf16 %v127_v13, %v126_v12  ;;  %v128_v19 = vld [vmem:[#allocation2 + $0xa0] sm:$0xff] }
  0x17   :  { %484 = vmatprep.subr.bf16.mxu0 %v590_v0  ;;  %v129_v20 = vld [vmem:[#allocation2 + $0xa8] sm:$0xff]  ;;  %v491_v21 = vpack.c.bf16 %v36_v17, %v35_v16  ;;  %v37_v22 = vld [vmem:[#allocation2 + $0x40] sm:$0xff]  ;;  %v130_v25 = vld [vmem:[#allocation2 + $0xb0] sm:$0xff] }
  0x18   :  { %507 = vmatpush3.bf16.msra.mxu1 %v506_v15  ;;  %v38_v23 = vld [vmem:[#allocation2 + $0x48] sm:$0xff]  ;;  %v512_v24 = vpack.c.bf16 %v129_v20, %v128_v19  ;;  %v131_v26 = vld [vmem:[#allocation2 + $0xb8] sm:$0xff]  ;;  %v39_v28 = vld [vmem:[#allocation2 + $0x50] sm:$0xff] }
  0x19   :  { %508 = vmatprep.subr.bf16.mxu1 %v590_v0  ;;  %v494_v27 = vpack.c.bf16 %v38_v23, %v37_v22  ;;  %v40_v29 = vld [vmem:[#allocation2 + $0x58] sm:$0xff]  ;;  %v515_v30 = vpack.c.bf16 %v131_v26, %v130_v25  ;;  %v132_v31 = vld [vmem:[#allocation2 + $0xc0] sm:$0xff]  ;;  %v133_v32 = vld [vmem:[#allocation2 + $0xc8] sm:$0xff] }
  0x1a   :  { %486 = vmatpush3.bf16.msra.mxu0 %v485_v7  ;;  %v497_v33 = vpack.c.bf16 %v40_v29, %v39_v28  ;;  %v41_v34 = vld [vmem:[#allocation2 + $0x60] sm:$0xff]  ;;  %v42_v35 = vld [vmem:[#allocation2 + $0x68] sm:$0xff]  ;;  %v518_v36 = vpack.c.bf16 %v133_v32, %v132_v31  ;;  %v43_v38 = vld [vmem:[#allocation2 + $0x70] sm:$0xff] }
  0x1b   :  { %487 = vmatprep.subr.bf16.mxu0 %v590_v0  ;;  %v500_v37 = vpack.c.bf16 %v42_v35, %v41_v34  ;;  %v44_v39 = vld [vmem:[#allocation2 + $0x78] sm:$0xff]  ;;  %v28_v41 = vld [vmem:[%s670_s0] sm:$0xff]  ;;  %v134_v42 = vld [vmem:[#allocation2 + $0xd0] sm:$0xff] }
  0x1c   :  { %510 = vmatpush3.bf16.msra.mxu1 %v509_v18  ;;  %v503_v40 = vpack.c.bf16 %v44_v39, %v43_v38  ;;  %v135_v43 = vld [vmem:[#allocation2 + $0xd8] sm:$0xff]  ;;  %v136_v45 = vld [vmem:[#allocation2 + $0xe0] sm:$0xff]  ;;  %v137_v46 = vld [vmem:[#allocation2 + $0xe8] sm:$0xff] }
  0x1d   :  { %511 = vmatprep.subr.bf16.mxu1 %v590_v0  ;;  %v521_v44 = vpack.c.bf16 %v135_v43, %v134_v42  ;;  %v524_v47 = vpack.c.bf16 %v137_v46, %v136_v45  ;;  %v138_v48 = vld [vmem:[#allocation2 + $0xf0] sm:$0xff]  ;;  %v139_v49 = vld [vmem:[#allocation2 + $0xf8] sm:$0xff]  ;;  %v220_v51 = vld [vmem:[#allocation2 + $0x100] sm:$0xff] }
  0x1e   :  { %489 = vmatpush3.bf16.msra.mxu0 %v488_v14  ;;  %v527_v50 = vpack.c.bf16 %v139_v49, %v138_v48  ;;  %v221_v52 = vld [vmem:[#allocation2 + $0x108] sm:$0xff]  ;;  %v222_v53 = vld [vmem:[#allocation2 + $0x110] sm:$0xff]  ;;  %v223_v55 = vld [vmem:[#allocation2 + $0x118] sm:$0xff] }
  0x1f   :  { %490 = vmatprep.subr.bf16.mxu0 %v590_v0  ;;  %v530_v54 = vpack.c.bf16 %v221_v52, %v220_v51  ;;  %v533_v56 = vpack.c.bf16 %v223_v55, %v222_v53  ;;  %v224_v57 = vld [vmem:[#allocation2 + $0x120] sm:$0xff]  ;;  %v225_v58 = vld [vmem:[#allocation2 + $0x128] sm:$0xff]  ;;  %v226_v60 = vld [vmem:[#allocation2 + $0x130] sm:$0xff] }
  0x20   :  { %513 = vmatpush3.bf16.msra.mxu1 %v512_v24  ;;  %v536_v59 = vpack.c.bf16 %v225_v58, %v224_v57  ;;  %v227_v61 = vld [vmem:[#allocation2 + $0x138] sm:$0xff]  ;;  %v228_v63 = vld [vmem:[#allocation2 + $0x140] sm:$0xff]  ;;  %v230_v8 = vld [vmem:[#allocation2 + $0x150] sm:$0xff] }
  0x21   :  { %514 = vmatprep.subr.bf16.mxu1 %v590_v0  ;;  %v539_v62 = vpack.c.bf16 %v227_v61, %v226_v60  ;;  %v320_v3 = vld [vmem:[%s672_s2] ss:$0 sm:$0xff]  ;;  %v231_v9 = vld [vmem:[#allocation2 + $0x158] sm:$0xff]  ;;  %v233_v12 = vld [vmem:[#allocation2 + $0x168] sm:$0xff] }
  0x22   :  { %492 = vmatpush3.bf16.msra.mxu0 %v491_v21  ;;  %v545_v10 = vpack.c.bf16 %v231_v9, %v230_v8  ;;  %v232_v11 = vld [vmem:[#allocation2 + $0x160] sm:$0xff]  ;;  %v234_v14 = vld [vmem:[#allocation2 + $0x170] sm:$0xff]  ;;  %v235_v15 = vld [vmem:[#allocation2 + $0x178] sm:$0xff] }
  0x23   :  { %493 = vmatprep.subr.bf16.mxu0 %v590_v0  ;;  %v548_v13 = vpack.c.bf16 %v233_v12, %v232_v11  ;;  %v551_v16 = vpack.c.bf16 %v235_v15, %v234_v14  ;;  %v322_v17 = vld [vmem:[%s672_s2 + $0x1] ss:$0 sm:$0xff]  ;;  %v324_v22 = vld [vmem:[%s672_s2 + $0x2] ss:$0 sm:$0xff] }
  0x24   :  { %516 = vmatpush3.bf16.msra.mxu1 %v515_v30 }
  0x25   :  { %517 = vmatprep.subr.bf16.mxu1 %v590_v0 }
  0x26   :  { %495 = vmatpush3.bf16.msra.mxu0 %v494_v27 }
  0x27   :  { %496 = vmatprep.subr.bf16.mxu0 %v590_v0 }
  0x28   :  { %519 = vmatpush3.bf16.msra.mxu1 %v518_v36 }
  0x29   :  { %520 = vmatprep.subr.bf16.mxu1 %v590_v0 }
  0x2a   :  { %498 = vmatpush3.bf16.msra.mxu0 %v497_v33 }
  0x2b   :  { %499 = vmatprep.subr.bf16.mxu0 %v590_v0 }
  0x2c   :  { %522 = vmatpush3.bf16.msra.mxu1 %v521_v44 }
  0x2d   :  { %523 = vmatprep.subr.bf16.mxu1 %v590_v0 }
  0x2e   :  { %501 = vmatpush3.bf16.msra.mxu0 %v500_v37 }
  0x2f   :  { %502 = vmatprep.subr.bf16.mxu0 %v590_v0 }
  0x30   :  { %525 = vmatpush3.bf16.msra.mxu1 %v524_v47 }
  0x31   :  { %526 = vmatprep.subr.bf16.mxu1 %v590_v0 }
  0x32   :  { %504 = vmatpush3.bf16.msra.mxu0 %v503_v40 }
  0x33   :  { %529 = vmatprep.subr.bf16.mxu0 %v590_v0 }
  0x34   :  { %528 = vmatpush3.bf16.msra.mxu1 %v527_v50 }
  0x35   :  { %409 = vmatmul.mubr.f32.vlgmr.msra.gmra.mrb[0].mxu0 %v28_v41 }
  0x36   :  { %478 = vmatprep.mubr.msk.f32.mxu0 %vm591_vm0, %v592_v1  ;;  %531 = vmatpush3.bf16.msra.mxu0 %v530_v54  ;;  %v229_v1 = vld [vmem:[#allocation2 + $0x148] sm:$0xff] }
  0x37   :  { %532 = vmatprep.subr.bf16.mxu0 %v590_v0  ;;  %v542_v2 = vpack.c.bf16 %v229_v1, %v228_v63 }
  0x3a   :  { %534 = vmatpush3.bf16.msra.mxu0 %v533_v56 }
  0x3b   :  { %535 = vmatprep.subr.bf16.mxu0 %v590_v0 }
  0x3e   :  { %537 = vmatpush3.bf16.msra.mxu0 %v536_v59 }
  0x3f   :  { %538 = vmatprep.subr.bf16.mxu0 %v590_v0 }
  0x42   :  { %540 = vmatpush3.bf16.msra.mxu0 %v539_v62 }
  0x43   :  { %541 = vmatprep.subr.bf16.mxu0 %v590_v0 }
  0x46   :  { %543 = vmatpush3.bf16.msra.mxu0 %v542_v2 }
  0x47   :  { %544 = vmatprep.subr.bf16.mxu0 %v590_v0 }
  0x4a   :  { %546 = vmatpush3.bf16.msra.mxu0 %v545_v10 }
  0x4b   :  { %547 = vmatprep.subr.bf16.mxu0 %v590_v0 }
  0x4e   :  { %549 = vmatpush3.bf16.msra.mxu0 %v548_v13 }
  0x4f   :  { %550 = vmatprep.subr.bf16.mxu0 %v590_v0 }
  0x52   :  { %552 = vmatpush3.bf16.msra.mxu0 %v551_v16 }
 0x108   :  { %v118_v4 = vpop.f32.mrb[0].mxu0 }
 0x109   :  { %v119_v5 = vadd.f32 %v320_v3, %v118_v4  ;;  %v410_v6 = vpop.f32.mrb[1].mxu0 }
 0x10b   :  { %559 = vtanh.f32 %v119_v5 }
 0x115   :  { %v560_v7 = vpop.eup %559 }
 0x116   :  { %444 = vmatmul.mubr.f32.vlgmr.msra.gmra.mrb[0].mxu1 %v560_v7 }
 0x1e9   :  { %v214_v18 = vpop.f32.mrb[0].mxu1 }
 0x1ea   :  { %v215_v19 = vadd.f32 %v322_v17, %v214_v18  ;;  %v445_v20 = vpop.f32.mrb[1].mxu1 }
 0x1ec   :  { %561 = vtanh.f32 %v215_v19 }
 0x1f6   :  { %v562_v21 = vpop.eup %561 }
 0x1f7   :  { %479 = vmatmul.mubr.f32.vlgmr.msra.gmra.mrb[2].mxu0 %v562_v21 }
 0x2ca   :  { %v310_v23 = vpop.f32.mrb[2].mxu0 }
 0x2cb   :  { %v311_v24 = vadd.f32 %v324_v22, %v310_v23  ;;  %v480_v25 = vpop.f32.mrb[3].mxu0 }
 0x2cd   :  { %314 = vst [vmem:[%s673_s3] sm:$0xff] %v311_v24 }
 0x2ce   :  { %319 = vsyncpa [#allocation3], 1 }

</bundles_post_ra>
